<compile_context>
chip_gen: v6e
topology: v6e:2x2x1
jax: 0.10.0
libtpu: 0.0.40
codegen_flags: <defaults>
</compile_context>

<pallas_src>
import functools

import jax
import jax.numpy as jnp
from jax.experimental import pallas as pl
from jax.experimental.pallas import tpu as pltpu


def _round_up(x, m):
    return ((x + m - 1) // m) * m


def _mlp_kernel(x_ref, w1_ref, b1_ref, w2_ref, b2_ref, o_ref):
    # hidden = relu(x @ W1^T + b1)   -- MXU matmul, f32 accumulation
    h = jnp.dot(x_ref[...], w1_ref[...], preferred_element_type=jnp.float32)
    h = h + b1_ref[...]                       # (1, nhid_p) broadcasts over rows
    h = jnp.maximum(h, 0.0)                   # ReLU on the VPU
    # out = hidden @ W2^T + b2
    o = jnp.dot(h.astype(w2_ref.dtype), w2_ref[...],
                preferred_element_type=jnp.float32)
    o = o + b2_ref[...]
    o_ref[...] = o.astype(o_ref.dtype)


@functools.partial(jax.jit, static_argnames=("max_block_rows", "compute_dtype"))
def mlp_forward(x, w1_t, b1, w2_t, b2, *, max_block_rows=512,
                compute_dtype=jnp.bfloat16):
    """Fused MLP forward: relu(x @ w1_t + b1) @ w2_t + b2.

    x:    [N, nfeat]
    w1_t: [nfeat, nhid]   (PyTorch layer1.weight.T)
    b1:   [nhid]
    w2_t: [nhid, nclass]  (PyTorch layer2.weight.T)
    b2:   [nclass]
    """
    n, nfeat = x.shape
    nhid = w1_t.shape[1]
    nclass = w2_t.shape[1]
    out_dtype = x.dtype
    cd_bytes = jnp.dtype(compute_dtype).itemsize
    out_bytes = jnp.dtype(out_dtype).itemsize

    # Lane-dense padding: every matmul dim becomes a multiple of 128.
    nfeat_p = _round_up(nfeat, 128)
    nhid_p = _round_up(nhid, 128)
    nclass_p = _round_up(nclass, 128)

    # Per-block VMEM footprint for a given row-tile size.
    def vmem_estimate(br):
        return (2 * br * nfeat_p * cd_bytes          # x tile, double-buffered
                + nfeat_p * nhid_p * cd_bytes        # W1^T, single-buffered
                + nhid_p * nclass_p * cd_bytes       # W2^T, single-buffered
                + (nhid_p + nclass_p) * 4            # biases (f32)
                + 2 * br * nclass_p * out_bytes      # out tile, double-buffered
                + br * nhid_p * 4)                   # f32 hidden intermediate

    # Largest 128-multiple row tile (<= max_block_rows) that fits the budget.
    block_rows = min(_round_up(max(n, 1), 128), _round_up(max_block_rows, 128))
    while block_rows > 128 and vmem_estimate(block_rows) > 40 * 1024 * 1024:
        block_rows //= 2
    n_p = _round_up(n, block_rows)

    # Zero padding: padded rows/cols contribute exactly zero through both
    # layers (zero weights, zero bias, relu(0)=0), so slicing at the end is exact.
    x_p = jnp.pad(x, ((0, n_p - n), (0, nfeat_p - nfeat))).astype(compute_dtype)
    w1_p = jnp.pad(w1_t, ((0, nfeat_p - nfeat), (0, nhid_p - nhid))).astype(compute_dtype)
    w2_p = jnp.pad(w2_t, ((0, nhid_p - nhid), (0, nclass_p - nclass))).astype(compute_dtype)
    b1_p = jnp.pad(b1.astype(jnp.float32).reshape(1, nhid),
                   ((0, 0), (0, nhid_p - nhid)))
    b2_p = jnp.pad(b2.astype(jnp.float32).reshape(1, nclass),
                   ((0, 0), (0, nclass_p - nclass)))

    grid = (n_p // block_rows,)

    vmem_limit = min(max(int(vmem_estimate(block_rows) * 1.5), 16 * 1024 * 1024),
                     96 * 1024 * 1024)

    cost = pl.CostEstimate(
        flops=2 * n_p * (nfeat_p * nhid_p + nhid_p * nclass_p),
        transcendentals=0,
        bytes_accessed=(x_p.size * cd_bytes + w1_p.size * cd_bytes
                        + w2_p.size * cd_bytes + b1_p.size * 4 + b2_p.size * 4
                        + n_p * nclass_p * out_bytes),
    )

    out_p = pl.pallas_call(
        _mlp_kernel,
        out_shape=jax.ShapeDtypeStruct((n_p, nclass_p), out_dtype),
        grid_spec=pltpu.PrefetchScalarGridSpec(
            num_scalar_prefetch=0,
            grid=grid,
            in_specs=[
                # Streaming row tiles of x (double-buffered by default).
                pl.BlockSpec((block_rows, nfeat_p), lambda i: (i, 0)),
                # Weights / biases: constant block index -> resident across the
                # grid; single buffer so they do not pay 2x VMEM.
                pl.BlockSpec((nfeat_p, nhid_p), lambda i: (0, 0),
                             pipeline_mode=pl.Buffered(1)),
                pl.BlockSpec((1, nhid_p), lambda i: (0, 0),
                             pipeline_mode=pl.Buffered(1)),
                pl.BlockSpec((nhid_p, nclass_p), lambda i: (0, 0),
                             pipeline_mode=pl.Buffered(1)),
                pl.BlockSpec((1, nclass_p), lambda i: (0, 0),
                             pipeline_mode=pl.Buffered(1)),
            ],
            out_specs=pl.BlockSpec((block_rows, nclass_p), lambda i: (i, 0)),
        ),
        compiler_params=pltpu.CompilerParams(
            dimension_semantics=("parallel",),   # row axis shards across TCs (v7x)
            vmem_limit_bytes=vmem_limit,
        ),
        cost_estimate=cost,
    )(x_p, w1_p, b1_p, w2_p, b2_p)

    # Strip row/lane padding.
    return out_p[:n, :nclass]


def init_linear_params(key, in_features, out_features, dtype=jnp.float32):
    """Deterministic init mimicking nn.Linear default (uniform +/- 1/sqrt(in))."""
    kw, kb = jax.random.split(key)
    bound = 1.0 / jnp.sqrt(jnp.asarray(in_features, dtype))
    w = jax.random.uniform(kw, (out_features, in_features), dtype,
                           minval=-bound, maxval=bound)
    b = jax.random.uniform(kb, (out_features,), dtype,
                           minval=-bound, maxval=bound)
    return w, b


if __name__ == "__main__":
    # Small shapes consistent with the module's forward: x is [N, nfeat].
    N, NFEAT, NHID, NCLASS = 8, 32, 64, 16

    key = jax.random.PRNGKey(0)
    kx, k1, k2 = jax.random.split(key, 3)

    x = jax.random.normal(kx, (N, NFEAT), jnp.float32)
    w1, b1 = init_linear_params(k1, NFEAT, NHID)    # layer1: [nhid, nfeat], [nhid]
    w2, b2 = init_linear_params(k2, NHID, NCLASS)   # layer2: [nclass, nhid], [nclass]

    # Pure-JAX reference (eval-mode dropout == identity, use_bn=False).
    h_ref = jnp.maximum(x @ w1.T + b1, 0.0)
    y_ref = h_ref @ w2.T + b2

    # f32 compute path: tight check.
    out_f32 = jax.block_until_ready(
        mlp_forward(x, w1.T, b1, w2.T, b2, compute_dtype=jnp.float32))
    assert out_f32.shape == (N, NCLASS)
    assert jnp.allclose(out_f32, y_ref, atol=1e-5, rtol=1e-5)

    # Default bf16 compute path (f32 MXU accumulation): looser tolerance.
    out_bf16 = jax.block_until_ready(mlp_forward(x, w1.T, b1, w2.T, b2))
    assert out_bf16.shape == (N, NCLASS)
    assert jnp.allclose(out_bf16, y_ref, atol=3e-2, rtol=3e-2)

    print("KERNEL_OK")
</pallas_src>

<mosaic_0001>
module attributes {stable_mosaic.version = 11 : i64} {
  func.func @_mlp_kernel(%arg0: i32, %arg1: memref<128x128xf32, #tpu.memory_space<vmem>>, %arg2: memref<128x128xf32, #tpu.memory_space<vmem>>, %arg3: memref<1x128xf32, #tpu.memory_space<vmem>>, %arg4: memref<128x128xf32, #tpu.memory_space<vmem>>, %arg5: memref<1x128xf32, #tpu.memory_space<vmem>>, %arg6: memref<128x128xf32, #tpu.memory_space<vmem>>) attributes {dimension_semantics = [#tpu.dimension_semantics<parallel>], iteration_bounds = array<i64: 1>, scalar_prefetch = 0 : i64, scratch_operands = 0 : i64, tpu.core_type = #tpu.core_type<tc>, window_params = [{transform_indices = @transform_0, window_bounds = array<i64: 128, 128>}, {pipeline_mode = #tpu.pipeline_mode<synchronous>, transform_indices = @transform_1, window_bounds = array<i64: 128, 128>}, {pipeline_mode = #tpu.pipeline_mode<synchronous>, transform_indices = @transform_2, window_bounds = array<i64: 1, 128>}, {pipeline_mode = #tpu.pipeline_mode<synchronous>, transform_indices = @transform_3, window_bounds = array<i64: 128, 128>}, {pipeline_mode = #tpu.pipeline_mode<synchronous>, transform_indices = @transform_4, window_bounds = array<i64: 1, 128>}, {transform_indices = @transform_5, window_bounds = array<i64: 128, 128>}]} {
    %c0 = arith.constant 0 : index
    %c0_0 = arith.constant 0 : index
    %0 = vector.load %arg1[%c0, %c0_0] : memref<128x128xf32, #tpu.memory_space<vmem>>, vector<128x128xf32>
    %c0_1 = arith.constant 0 : index
    %c0_2 = arith.constant 0 : index
    %1 = vector.load %arg2[%c0_1, %c0_2] : memref<128x128xf32, #tpu.memory_space<vmem>>, vector<128x128xf32>
    %cst = arith.constant dense<0.000000e+00> : vector<128x128xf32>
    %2 = tpu.matmul %0, %1, %cst {dimension_numbers = #tpu.dot_dimension_numbers<[1], [0], [0], [1], [0, 0, 1, 1], [], []>} : vector<128x128xf32>, vector<128x128xf32>, vector<128x128xf32> -> vector<128x128xf32>
    %c0_3 = arith.constant 0 : index
    %c0_4 = arith.constant 0 : index
    %3 = vector.load %arg3[%c0_3, %c0_4] : memref<1x128xf32, #tpu.memory_space<vmem>>, vector<1x128xf32>
    %4 = vector.broadcast %3 : vector<1x128xf32> to vector<128x128xf32>
    %5 = arith.addf %2, %4 : vector<128x128xf32>
    %cst_5 = arith.constant 0.000000e+00 : f32
    %6 = vector.broadcast %cst_5 : f32 to vector<128x128xf32>
    %7 = arith.maximumf %5, %6 : vector<128x128xf32>
    %c0_6 = arith.constant 0 : index
    %c0_7 = arith.constant 0 : index
    %8 = vector.load %arg4[%c0_6, %c0_7] : memref<128x128xf32, #tpu.memory_space<vmem>>, vector<128x128xf32>
    %cst_8 = arith.constant dense<0.000000e+00> : vector<128x128xf32>
    %9 = tpu.matmul %7, %8, %cst_8 {dimension_numbers = #tpu.dot_dimension_numbers<[1], [0], [0], [1], [0, 0, 1, 1], [], []>} : vector<128x128xf32>, vector<128x128xf32>, vector<128x128xf32> -> vector<128x128xf32>
    %c0_9 = arith.constant 0 : index
    %c0_10 = arith.constant 0 : index
    %10 = vector.load %arg5[%c0_9, %c0_10] : memref<1x128xf32, #tpu.memory_space<vmem>>, vector<1x128xf32>
    %11 = vector.broadcast %10 : vector<1x128xf32> to vector<128x128xf32>
    %12 = arith.addf %9, %11 : vector<128x128xf32>
    %c0_11 = arith.constant 0 : index
    %c0_12 = arith.constant 0 : index
    %13 = vector.load %arg6[%c0_11, %c0_12] : memref<128x128xf32, #tpu.memory_space<vmem>>, vector<128x128xf32>
    tpu.vector_store %arg6[%c0_11, %c0_12], %12 {strides = array<i32>} : memref<128x128xf32, #tpu.memory_space<vmem>>, vector<128x128xf32>,
    return
  }
  func.func @transform_0(%arg0: i32) -> (i32, i32) {
    %c0_i32 = arith.constant 0 : i32
    %c0_i32_0 = arith.constant 0 : i32
    return %arg0, %c0_i32 : i32, i32
  }
  func.func @transform_1(%arg0: i32) -> (i32, i32) {
    %c0_i32 = arith.constant 0 : i32
    %c0_i32_0 = arith.constant 0 : i32
    %c0_i32_1 = arith.constant 0 : i32
    return %c0_i32, %c0_i32_0 : i32, i32
  }
  func.func @transform_2(%arg0: i32) -> (i32, i32) {
    %c0_i32 = arith.constant 0 : i32
    %c0_i32_0 = arith.constant 0 : i32
    %c0_i32_1 = arith.constant 0 : i32
    return %c0_i32, %c0_i32_0 : i32, i32
  }
  func.func @transform_3(%arg0: i32) -> (i32, i32) {
    %c0_i32 = arith.constant 0 : i32
    %c0_i32_0 = arith.constant 0 : i32
    %c0_i32_1 = arith.constant 0 : i32
    return %c0_i32, %c0_i32_0 : i32, i32
  }
  func.func @transform_4(%arg0: i32) -> (i32, i32) {
    %c0_i32 = arith.constant 0 : i32
    %c0_i32_0 = arith.constant 0 : i32
    %c0_i32_1 = arith.constant 0 : i32
    return %c0_i32, %c0_i32_0 : i32, i32
  }
  func.func @transform_5(%arg0: i32) -> (i32, i32) {
    %c0_i32 = arith.constant 0 : i32
    %c0_i32_0 = arith.constant 0 : i32
    return %arg0, %c0_i32 : i32, i32
  }
}

</mosaic_0001>

<bundles_post_ra>
// kernel: mlp_forward.1
= control target key start
LH: loop header
LB: loop body
LE: loop exit
PB: predicated region body
PF: predicated region fallthrough
CT: control target
= control target key end

     0   :  { %s814_s1 = inlined_call_operand.vmem [shape: f32[128,128], index: 1, kind: input, shape index: {}]   ;;  %s815_s0 = inlined_call_operand.vmem [shape: f32[128,128], index: 0, kind: input, shape index: {}]   ;;  %s816_s3 = inlined_call_operand.vmem [shape: f32[128,128], index: 3, kind: input, shape index: {}]   ;;  %s817_s2 = inlined_call_operand.vmem [shape: f32[1,128], index: 2, kind: input, shape index: {}]   ;;  %s818_s4 = inlined_call_operand.vmem [shape: f32[1,128], index: 4, kind: input, shape index: {}]   ;;  %s819_s5 = inlined_call_operand.vmem [shape: f32[128,128], index: 5, kind: output, shape index: {}]  }
   0x1   :  { %v51_v0 = vld [vmem:[%s814_s1 + $0x78] sm:$0xff]  ;;  %v50_v1 = vld [vmem:[%s814_s1 + $0x70] sm:$0xff]  ;;  %v49_v2 = vld [vmem:[%s814_s1 + $0x68] sm:$0xff] }
   0x2   :  { %474 = vmatprep.subr.mxu0 %v51_v0  ;;  %v48_v3 = vld [vmem:[%s814_s1 + $0x60] sm:$0xff]  ;;  %v47_v5 = vld [vmem:[%s814_s1 + $0x58] sm:$0xff]  ;;  %v46_v6 = vld [vmem:[%s814_s1 + $0x50] sm:$0xff] }
   0x3   :  { %475 = vmatpush3.msra.mxu0 %v51_v0  ;;  %v20_v4 = vld [vmem:[%s815_s0] sm:$0xff]  ;;  %v45_v7 = vld [vmem:[%s814_s1 + $0x48] sm:$0xff]  ;;  %v235_v8 = vld [vmem:[%s816_s3 + $0x78] sm:$0xff] }
   0x4   :  { %476 = vmatprep.subr.mxu0 %v50_v1  ;;  %506 = vmatprep.mubr.f32.mxu0 %v20_v4  ;;  %v234_v9 = vld [vmem:[%s816_s3 + $0x70] sm:$0xff]  ;;  %v44_v10 = vld [vmem:[%s814_s1 + $0x40] sm:$0xff]  ;;  %v233_v11 = vld [vmem:[%s816_s3 + $0x68] sm:$0xff] }
   0x5   :  { %477 = vmatpush3.msra.mxu0 %v50_v1  ;;  %530 = vmatprep.subr.mxu1 %v235_v8  ;;  %v43_v12 = vld [vmem:[%s814_s1 + $0x38] sm:$0xff]  ;;  %v232_v13 = vld [vmem:[%s816_s3 + $0x60] sm:$0xff]  ;;  %v42_v14 = vld [vmem:[%s814_s1 + $0x30] sm:$0xff] }
   0x6   :  { %478 = vmatprep.subr.mxu0 %v49_v2  ;;  %531 = vmatpush3.msra.mxu1 %v235_v8  ;;  %v231_v15 = vld [vmem:[%s816_s3 + $0x58] sm:$0xff]  ;;  %v41_v16 = vld [vmem:[%s814_s1 + $0x28] sm:$0xff]  ;;  %v230_v17 = vld [vmem:[%s816_s3 + $0x50] sm:$0xff] }
   0x7   :  { %479 = vmatpush3.msra.mxu0 %v49_v2  ;;  %532 = vmatprep.subr.mxu1 %v234_v9  ;;  %v40_v18 = vld [vmem:[%s814_s1 + $0x20] sm:$0xff]  ;;  %v229_v19 = vld [vmem:[%s816_s3 + $0x48] sm:$0xff]  ;;  %v39_v20 = vld [vmem:[%s814_s1 + $0x18] sm:$0xff] }
   0x8   :  { %480 = vmatprep.subr.mxu0 %v48_v3  ;;  %533 = vmatpush3.msra.mxu1 %v234_v9  ;;  %v228_v21 = vld [vmem:[%s816_s3 + $0x40] sm:$0xff]  ;;  %v38_v22 = vld [vmem:[%s814_s1 + $0x10] sm:$0xff]  ;;  %v227_v23 = vld [vmem:[%s816_s3 + $0x38] sm:$0xff] }
   0x9   :  { %481 = vmatpush3.msra.mxu0 %v48_v3  ;;  %534 = vmatprep.subr.mxu1 %v233_v11  ;;  %v37_v24 = vld [vmem:[%s814_s1 + $0x8] sm:$0xff]  ;;  %v226_v25 = vld [vmem:[%s816_s3 + $0x30] sm:$0xff]  ;;  %v36_v26 = vld [vmem:[%s814_s1] sm:$0xff] }
   0xa   :  { %482 = vmatprep.subr.mxu0 %v47_v5  ;;  %535 = vmatpush3.msra.mxu1 %v233_v11  ;;  %v225_v27 = vld [vmem:[%s816_s3 + $0x28] sm:$0xff]  ;;  %v224_v29 = vld [vmem:[%s816_s3 + $0x20] sm:$0xff]  ;;  %v22_v30 = vld [vmem:[%s815_s0 + $0x10] sm:$0xff] }
   0xb   :  { %483 = vmatpush3.msra.mxu0 %v47_v5  ;;  %536 = vmatprep.subr.mxu1 %v232_v13  ;;  %v21_v28 = vld [vmem:[%s815_s0 + $0x8] sm:$0xff]  ;;  %v23_v31 = vld [vmem:[%s815_s0 + $0x18] sm:$0xff]  ;;  %v24_v32 = vld [vmem:[%s815_s0 + $0x20] sm:$0xff] }
   0xc   :  { %484 = vmatprep.subr.mxu0 %v46_v6  ;;  %537 = vmatpush3.msra.mxu1 %v232_v13  ;;  %v25_v33 = vld [vmem:[%s815_s0 + $0x28] sm:$0xff]  ;;  %v26_v34 = vld [vmem:[%s815_s0 + $0x30] sm:$0xff]  ;;  %v27_v35 = vld [vmem:[%s815_s0 + $0x38] sm:$0xff] }
   0xd   :  { %485 = vmatpush3.msra.mxu0 %v46_v6  ;;  %538 = vmatprep.subr.mxu1 %v231_v15  ;;  %v28_v36 = vld [vmem:[%s815_s0 + $0x40] sm:$0xff]  ;;  %v29_v37 = vld [vmem:[%s815_s0 + $0x48] sm:$0xff]  ;;  %v30_v38 = vld [vmem:[%s815_s0 + $0x50] sm:$0xff] }
   0xe   :  { %486 = vmatprep.subr.mxu0 %v45_v7  ;;  %539 = vmatpush3.msra.mxu1 %v231_v15  ;;  %v31_v39 = vld [vmem:[%s815_s0 + $0x58] sm:$0xff]  ;;  %v32_v40 = vld [vmem:[%s815_s0 + $0x60] sm:$0xff]  ;;  %v33_v41 = vld [vmem:[%s815_s0 + $0x68] sm:$0xff] }
   0xf   :  { %487 = vmatpush3.msra.mxu0 %v45_v7  ;;  %540 = vmatprep.subr.mxu1 %v230_v17  ;;  %v34_v42 = vld [vmem:[%s815_s0 + $0x70] sm:$0xff]  ;;  %v35_v43 = vld [vmem:[%s815_s0 + $0x78] sm:$0xff]  ;;  %v221_v46 = vld [vmem:[%s816_s3 + $0x8] sm:$0xff] }
  0x10   :  { %488 = vmatprep.subr.mxu0 %v44_v10  ;;  %541 = vmatpush3.msra.mxu1 %v230_v17  ;;  %v223_v44 = vld [vmem:[%s816_s3 + $0x18] sm:$0xff]  ;;  %v222_v45 = vld [vmem:[%s816_s3 + $0x10] sm:$0xff]  ;;  %v220_v47 = vld [vmem:[%s816_s3] sm:$0xff] }
  0x11   :  { %489 = vmatpush3.msra.mxu0 %v44_v10  ;;  %542 = vmatprep.subr.mxu1 %v229_v19  ;;  %v408_v48 = vld [vmem:[%s817_s2] ss:$0 sm:$0xff] }
  0x12   :  { %490 = vmatprep.subr.mxu0 %v43_v12  ;;  %543 = vmatpush3.msra.mxu1 %v229_v19 }
  0x13   :  { %491 = vmatpush3.msra.mxu0 %v43_v12  ;;  %544 = vmatprep.subr.mxu1 %v228_v21 }
  0x14   :  { %492 = vmatprep.subr.mxu0 %v42_v14  ;;  %545 = vmatpush3.msra.mxu1 %v228_v21 }
  0x15   :  { %493 = vmatpush3.msra.mxu0 %v42_v14  ;;  %546 = vmatprep.subr.mxu1 %v227_v23 }
  0x16   :  { %494 = vmatprep.subr.mxu0 %v41_v16  ;;  %547 = vmatpush3.msra.mxu1 %v227_v23 }
  0x17   :  { %495 = vmatpush3.msra.mxu0 %v41_v16  ;;  %548 = vmatprep.subr.mxu1 %v226_v25 }
  0x18   :  { %496 = vmatprep.subr.mxu0 %v40_v18  ;;  %549 = vmatpush3.msra.mxu1 %v226_v25 }
  0x19   :  { %497 = vmatpush3.msra.mxu0 %v40_v18  ;;  %550 = vmatprep.subr.mxu1 %v225_v27 }
  0x1a   :  { %498 = vmatprep.subr.mxu0 %v39_v20  ;;  %551 = vmatpush3.msra.mxu1 %v225_v27 }
  0x1b   :  { %499 = vmatpush3.msra.mxu0 %v39_v20  ;;  %552 = vmatprep.subr.mxu1 %v224_v29 }
  0x1c   :  { %500 = vmatprep.subr.mxu0 %v38_v22  ;;  %553 = vmatpush3.msra.mxu1 %v224_v29 }
  0x1d   :  { %501 = vmatpush3.msra.mxu0 %v38_v22  ;;  %554 = vmatprep.subr.mxu1 %v223_v44 }
  0x1e   :  { %502 = vmatprep.subr.mxu0 %v37_v24  ;;  %555 = vmatpush3.msra.mxu1 %v223_v44 }
  0x1f   :  { %503 = vmatpush3.msra.mxu0 %v37_v24  ;;  %556 = vmatprep.subr.mxu1 %v222_v45 }
  0x20   :  { %504 = vmatprep.subr.mxu0 %v36_v26  ;;  %557 = vmatpush3.msra.mxu1 %v222_v45 }
  0x21   :  { %505 = vmatpush3.msra.mxu0 %v36_v26  ;;  %558 = vmatprep.subr.mxu1 %v221_v46 }
  0x22   :  { %507 = vmatmul.mubr.f32.vlgmr.msra.gmra.mxu0 %v21_v28  ;;  %559 = vmatpush3.msra.mxu1 %v221_v46 }
  0x23   :  { %509 = vmatprep.mubr.f32.mxu0 %v22_v30  ;;  %560 = vmatprep.subr.mxu1 %v220_v47 }
  0x24   :  { %561 = vmatpush3.msra.mxu1 %v220_v47 }
  0x26   :  { %510 = vmatmul.mubr.f32.gmra.mxu0 %v23_v31 }
  0x27   :  { %512 = vmatprep.mubr.f32.mxu0 %v24_v32 }
  0x2a   :  { %513 = vmatmul.mubr.f32.gmra.mxu0 %v25_v33  ;;  %v409_v33 = vld [vmem:[%s818_s4] ss:$0 sm:$0xff] }
  0x2b   :  { %515 = vmatprep.mubr.f32.mxu0 %v26_v34 }
  0x2e   :  { %516 = vmatmul.mubr.f32.gmra.mxu0 %v27_v35 }
  0x2f   :  { %518 = vmatprep.mubr.f32.mxu0 %v28_v36 }
  0x32   :  { %519 = vmatmul.mubr.f32.gmra.mxu0 %v29_v37 }
  0x33   :  { %521 = vmatprep.mubr.f32.mxu0 %v30_v38 }
  0x36   :  { %522 = vmatmul.mubr.f32.gmra.mxu0 %v31_v39 }
  0x37   :  { %524 = vmatprep.mubr.f32.mxu0 %v32_v40 }
  0x3a   :  { %525 = vmatmul.mubr.f32.gmra.mxu0 %v33_v41 }
  0x3b   :  { %527 = vmatprep.mubr.f32.mxu0 %v34_v42 }
  0x3e   :  { %528 = vmatmul.mubr.f32.gmra.mxu0 %v35_v43 }
  0xe2   :  { %v508_v49 = vpop.f32.mrf.mxu0 }
  0xe3   :  { %v131_v50 = vadd.f32 %v508_v49, %v408_v48 }
  0xe4   :  { %v125_v51 = vpop.f32.mrf.mxu0 }
  0xe5   :  { %v126_v52 = vadd.f32 %v408_v48, %v125_v51  ;;  %v205_v55 = vmax.f32 %v131_v50, 0.0 }
  0xe6   :  { %v511_v53 = vpop.f32.mrf.mxu0 }
  0xe7   :  { %v204_v54 = vmax.f32 %v126_v52, 0.0  ;;  %v141_v56 = vadd.f32 %v511_v53, %v408_v48 }
  0xe8   :  { %v135_v57 = vpop.f32.mrf.mxu0 }
  0xe9   :  { %v136_v58 = vadd.f32 %v408_v48, %v135_v57  ;;  %562 = vmatprep.mubr.f32.mxu1 %v204_v54  ;;  %v207_v61 = vmax.f32 %v141_v56, 0.0 }
  0xea   :  { %v514_v59 = vpop.f32.mrf.mxu0  ;;  %563 = vmatmul.mubr.f32.vlgmr.msra.gmra.mxu1 %v205_v55 }
  0xeb   :  { %v206_v60 = vmax.f32 %v136_v58, 0.0  ;;  %v151_v62 = vadd.f32 %v514_v59, %v408_v48 }
  0xec   :  { %v145_v63 = vpop.f32.mrf.mxu0 }
  0xed   :  { %v146_v0 = vadd.f32 %v408_v48, %v145_v63  ;;  %565 = vmatprep.mubr.f32.mxu1 %v206_v60  ;;  %v209_v3 = vmax.f32 %v151_v62, 0.0 }
  0xee   :  { %v517_v1 = vpop.f32.mrf.mxu0  ;;  %566 = vmatmul.mubr.f32.gmra.mxu1 %v207_v61 }
  0xef   :  { %v208_v2 = vmax.f32 %v146_v0, 0.0  ;;  %v161_v4 = vadd.f32 %v517_v1, %v408_v48 }
  0xf0   :  { %v155_v5 = vpop.f32.mrf.mxu0 }
  0xf1   :  { %v156_v6 = vadd.f32 %v408_v48, %v155_v5  ;;  %568 = vmatprep.mubr.f32.mxu1 %v208_v2  ;;  %v211_v9 = vmax.f32 %v161_v4, 0.0 }
  0xf2   :  { %v520_v7 = vpop.f32.mrf.mxu0  ;;  %569 = vmatmul.mubr.f32.gmra.mxu1 %v209_v3 }
  0xf3   :  { %v210_v8 = vmax.f32 %v156_v6, 0.0  ;;  %v171_v10 = vadd.f32 %v520_v7, %v408_v48 }
  0xf4   :  { %v165_v11 = vpop.f32.mrf.mxu0 }
  0xf5   :  { %v166_v12 = vadd.f32 %v408_v48, %v165_v11  ;;  %571 = vmatprep.mubr.f32.mxu1 %v210_v8  ;;  %v213_v15 = vmax.f32 %v171_v10, 0.0 }
  0xf6   :  { %v523_v13 = vpop.f32.mrf.mxu0  ;;  %572 = vmatmul.mubr.f32.gmra.mxu1 %v211_v9 }
  0xf7   :  { %v212_v14 = vmax.f32 %v166_v12, 0.0  ;;  %v181_v16 = vadd.f32 %v523_v13, %v408_v48 }
  0xf8   :  { %v175_v17 = vpop.f32.mrf.mxu0 }
  0xf9   :  { %v176_v18 = vadd.f32 %v408_v48, %v175_v17  ;;  %574 = vmatprep.mubr.f32.mxu1 %v212_v14  ;;  %v215_v21 = vmax.f32 %v181_v16, 0.0 }
  0xfa   :  { %v526_v19 = vpop.f32.mrf.mxu0  ;;  %575 = vmatmul.mubr.f32.gmra.mxu1 %v213_v15 }
  0xfb   :  { %v214_v20 = vmax.f32 %v176_v18, 0.0  ;;  %v191_v22 = vadd.f32 %v526_v19, %v408_v48 }
  0xfc   :  { %v185_v23 = vpop.f32.mrf.mxu0 }
  0xfd   :  { %v186_v24 = vadd.f32 %v408_v48, %v185_v23  ;;  %577 = vmatprep.mubr.f32.mxu1 %v214_v20  ;;  %v217_v27 = vmax.f32 %v191_v22, 0.0 }
  0xfe   :  { %v529_v25 = vpop.f32.mrf.mxu0  ;;  %578 = vmatmul.mubr.f32.gmra.mxu1 %v215_v21 }
  0xff   :  { %v216_v26 = vmax.f32 %v186_v24, 0.0  ;;  %v201_v28 = vadd.f32 %v529_v25, %v408_v48 }
 0x100   :  { %v195_v29 = vpop.f32.mrf.mxu0 }
 0x101   :  { %v196_v30 = vadd.f32 %v408_v48, %v195_v29  ;;  %580 = vmatprep.mubr.f32.mxu1 %v216_v26  ;;  %v219_v32 = vmax.f32 %v201_v28, 0.0 }
 0x102   :  { %581 = vmatmul.mubr.f32.gmra.mxu1 %v217_v27 }
 0x103   :  { %v218_v31 = vmax.f32 %v196_v30, 0.0 }
 0x105   :  { %583 = vmatprep.mubr.f32.mxu1 %v218_v31 }
 0x106   :  { %584 = vmatmul.mubr.f32.gmra.mxu1 %v219_v32 }
 0x1aa   :  { %v564_v34 = vpop.f32.mrf.mxu1 }
 0x1ab   :  { %v315_v35 = vadd.f32 %v564_v34, %v409_v33 }
 0x1ac   :  { %v309_v36 = vpop.f32.mrf.mxu1 }
 0x1ad   :  { %389 = vst [vmem:[%s819_s5 + $0x8] sm:$0xff] %v315_v35  ;;  %v310_v37 = vadd.f32 %v409_v33, %v309_v36 }
 0x1ae   :  { %v567_v38 = vpop.f32.mrf.mxu1 }
 0x1af   :  { %388 = vst [vmem:[%s819_s5] sm:$0xff] %v310_v37  ;;  %v325_v39 = vadd.f32 %v567_v38, %v409_v33 }
 0x1b0   :  { %v319_v40 = vpop.f32.mrf.mxu1 }
 0x1b1   :  { %391 = vst [vmem:[%s819_s5 + $0x18] sm:$0xff] %v325_v39  ;;  %v320_v41 = vadd.f32 %v409_v33, %v319_v40 }
 0x1b2   :  { %v570_v42 = vpop.f32.mrf.mxu1 }
 0x1b3   :  { %390 = vst [vmem:[%s819_s5 + $0x10] sm:$0xff] %v320_v41  ;;  %v335_v43 = vadd.f32 %v570_v42, %v409_v33 }
 0x1b4   :  { %v329_v44 = vpop.f32.mrf.mxu1 }
 0x1b5   :  { %393 = vst [vmem:[%s819_s5 + $0x28] sm:$0xff] %v335_v43  ;;  %v330_v45 = vadd.f32 %v409_v33, %v329_v44 }
 0x1b6   :  { %v573_v46 = vpop.f32.mrf.mxu1 }
 0x1b7   :  { %392 = vst [vmem:[%s819_s5 + $0x20] sm:$0xff] %v330_v45  ;;  %v345_v47 = vadd.f32 %v573_v46, %v409_v33 }
 0x1b8   :  { %v339_v48 = vpop.f32.mrf.mxu1 }
 0x1b9   :  { %395 = vst [vmem:[%s819_s5 + $0x38] sm:$0xff] %v345_v47  ;;  %v340_v49 = vadd.f32 %v409_v33, %v339_v48 }
 0x1ba   :  { %v576_v50 = vpop.f32.mrf.mxu1 }
 0x1bb   :  { %394 = vst [vmem:[%s819_s5 + $0x30] sm:$0xff] %v340_v49  ;;  %v355_v51 = vadd.f32 %v576_v50, %v409_v33 }
 0x1bc   :  { %v349_v52 = vpop.f32.mrf.mxu1 }
 0x1bd   :  { %397 = vst [vmem:[%s819_s5 + $0x48] sm:$0xff] %v355_v51  ;;  %v350_v53 = vadd.f32 %v409_v33, %v349_v52 }
 0x1be   :  { %v579_v54 = vpop.f32.mrf.mxu1 }
 0x1bf   :  { %396 = vst [vmem:[%s819_s5 + $0x40] sm:$0xff] %v350_v53  ;;  %v365_v55 = vadd.f32 %v579_v54, %v409_v33 }
 0x1c0   :  { %v359_v56 = vpop.f32.mrf.mxu1 }
 0x1c1   :  { %399 = vst [vmem:[%s819_s5 + $0x58] sm:$0xff] %v365_v55  ;;  %v360_v57 = vadd.f32 %v409_v33, %v359_v56 }
 0x1c2   :  { %v582_v58 = vpop.f32.mrf.mxu1 }
 0x1c3   :  { %398 = vst [vmem:[%s819_s5 + $0x50] sm:$0xff] %v360_v57  ;;  %v375_v59 = vadd.f32 %v582_v58, %v409_v33 }
 0x1c4   :  { %v369_v60 = vpop.f32.mrf.mxu1 }
 0x1c5   :  { %401 = vst [vmem:[%s819_s5 + $0x68] sm:$0xff] %v375_v59  ;;  %v370_v61 = vadd.f32 %v409_v33, %v369_v60 }
 0x1c6   :  { %v585_v62 = vpop.f32.mrf.mxu1 }
 0x1c7   :  { %400 = vst [vmem:[%s819_s5 + $0x60] sm:$0xff] %v370_v61  ;;  %v385_v63 = vadd.f32 %v585_v62, %v409_v33 }
 0x1c8   :  { %v379_v0 = vpop.f32.mrf.mxu1 }
 0x1c9   :  { %403 = vst [vmem:[%s819_s5 + $0x78] sm:$0xff] %v385_v63  ;;  %v380_v1 = vadd.f32 %v409_v33, %v379_v0 }
 0x1cb   :  { %402 = vst [vmem:[%s819_s5 + $0x70] sm:$0xff] %v380_v1 }

</bundles_post_ra>
